<compile_context>
chip_gen: v6e
topology: v6e:2x2x1
jax: 0.10.0
libtpu: 0.0.40
codegen_flags: <defaults>
</compile_context>

<pallas_src>
import functools
import math

import jax
import jax.numpy as jnp
from jax import lax
from jax.experimental import pallas as pl
from jax.experimental.pallas import tpu as pltpu

# ---------------- small synthetic config ----------------
N = 2            # batch
H = W = 8        # backbone feature spatial size
CIN = 16         # backbone output channels
D = 64           # hidden_dim (transformer.d_model)
GROUPS = 32      # GroupNorm groups (32 as in the module)
L = 3            # transformer.num_decoder_layers
Q = 16           # num_queries
CLIP_D = 32      # CLIP embedding dim
NCLS = 5         # number of text categories
EVAL_TAU = 1.0   # args.eval_tau   (module multiplies: (sim * tau).softmax(-1))
OBJ_ALPHA = 0.5  # args.objectness_alpha
NUM_LEVELS = 2   # num_feature_levels


def _inv_sigmoid(x, eps=1e-3):
    # matches DETR/DINO inverse_sigmoid
    x = jnp.clip(x, 0.0, 1.0)
    x1 = jnp.maximum(x, eps)
    x2 = jnp.maximum(1.0 - x, eps)
    return jnp.log(x1) - jnp.log(x2)


# -------- Kernel A: 1x1 conv + GroupNorm, all feature levels in one call --------
def input_proj_gn_kernel(x_ref, w_ref, b_ref, gamma_ref, beta_ref, p_ref, o_ref,
                         *, n, hw, eps=1e-5):
    # x_ref block: (1, N*HW, CIN) — whole batch folded into the matmul M dimension.
    x = x_ref[0]                                            # (N*HW, CIN)
    w = w_ref[0]                                            # (CIN, D)
    y = jnp.dot(x, w, preferred_element_type=jnp.float32) + b_ref[0]    # (N*HW, D)
    gamma = gamma_ref[0]                                    # (1, D)
    beta = beta_ref[0]                                      # (1, D)
    proj = p_ref[...]                                       # (D, D) group projector / (HW*cg)
    # GroupNorm statistics are per sample; N is tiny -> static unroll, static slices.
    for i in range(n):
        yi = y[i * hw:(i + 1) * hw, :]                      # (HW, D)
        s1 = jnp.sum(yi, axis=0, keepdims=True)             # (1, D)
        s2 = jnp.sum(yi * yi, axis=0, keepdims=True)        # (1, D)
        mean_c = jnp.dot(s1, proj, preferred_element_type=jnp.float32)   # (1, D)
        ex2_c = jnp.dot(s2, proj, preferred_element_type=jnp.float32)    # (1, D)
        var_c = jnp.maximum(ex2_c - mean_c * mean_c, 0.0)   # clamp single-pass variance
        y_n = (yi - mean_c) * lax.rsqrt(var_c + eps)
        o_ref[0, i * hw:(i + 1) * hw, :] = (y_n * gamma + beta).astype(o_ref.dtype)


def _group_projector(d, groups, hw):
    # P[c, c'] = 1/(HW*cg) iff channels c and c' belong to the same GroupNorm group,
    # so   mean_per_channel = row_sums @ P   and   E[x^2]_per_channel = sq_sums @ P.
    cg = d // groups
    ch = jnp.arange(d, dtype=jnp.int32)
    same = (ch[:, None] // cg) == (ch[None, :] // cg)
    return same.astype(jnp.float32) / float(hw * cg)


def input_proj_gn(x_levels, w_levels, b_levels, gamma_levels, beta_levels,
                  groups=GROUPS):
    # x_levels: (NLVL, N, HW, CIN); per-level conv weights / GN affine stacked.
    nlvl, n, hw, cin = x_levels.shape
    d = w_levels.shape[-1]
    x_flat = x_levels.reshape(nlvl, n * hw, cin)            # wrapper-side layout only
    proj = _group_projector(d, groups, hw)
    out = pl.pallas_call(
        functools.partial(input_proj_gn_kernel, n=n, hw=hw),
        out_shape=jax.ShapeDtypeStruct((nlvl, n * hw, d), jnp.float32),
        grid=(nlvl,),
        in_specs=[
            pl.BlockSpec((1, n * hw, cin), lambda l: (l, 0, 0)),
            pl.BlockSpec((1, cin, d), lambda l: (l, 0, 0)),
            pl.BlockSpec((1, 1, d), lambda l: (l, 0, 0)),
            pl.BlockSpec((1, 1, d), lambda l: (l, 0, 0)),
            pl.BlockSpec((1, 1, d), lambda l: (l, 0, 0)),
            pl.BlockSpec((d, d), lambda l: (0, 0)),
        ],
        out_specs=pl.BlockSpec((1, n * hw, d), lambda l: (l, 0, 0)),
        compiler_params=pltpu.CompilerParams(
            dimension_semantics=("parallel",)),   # v7x: 2 TCs can split the level axis
    )(x_flat, w_levels, b_levels, gamma_levels, beta_levels, proj)
    return out.reshape(nlvl, n, hw, d)


# ---- Kernel B: decoder heads (all layers at once) + eval-time CLIP fusion, fused ----
def heads_fuse_kernel(hs_ref, ref_ref, roi_ref, txt_ref,
                      w1_ref, b1_ref, w2_ref, b2_ref, w3_ref, wc_ref, bl_ref,
                      head_ref, fused_ref, *, n_last, tau, alpha):
    h = hs_ref[...]                                         # (R, D), R = L*B*Q
    x1 = jnp.maximum(
        jnp.dot(h, w1_ref[...], preferred_element_type=jnp.float32) + b1_ref[...], 0.0)
    x2 = jnp.maximum(
        jnp.dot(x1, w2_ref[...], preferred_element_type=jnp.float32) + b2_ref[...], 0.0)
    # merged last layer: columns [bbox delta (4) | class logit (1)]
    last = (jnp.dot(x2, w3_ref[...], preferred_element_type=jnp.float32)
            + jnp.dot(h, wc_ref[...], preferred_element_type=jnp.float32)
            + bl_ref[...])                                  # (R, 5)
    r, c = last.shape
    col = lax.broadcasted_iota(jnp.int32, (r, c), 1)
    # ref_ref is padded to 5 columns in the wrapper (dummy col = 0.5 -> inv_sigmoid 0);
    # column 4 of `shifted` is discarded by the where below.
    shifted = jax.nn.sigmoid(last + _inv_sigmoid(ref_ref[...]))
    head = jnp.where(col < 4, shifted, last)                # [:, :4]=boxes, [:, 4]=logit
    head_ref[...] = head.astype(head_ref.dtype)

    # eval-time CLIP fusion, consuming the last decoder layer's logits in-register
    logit_last = last[r - n_last:, 4:5]                     # (B*Q, 1)
    sim = jnp.dot(roi_ref[...], txt_ref[...],
                  preferred_element_type=jnp.float32) * tau             # (B*Q, NCLS)
    # softmax over [sim, 0] (the appended zero column) without materializing the concat
    m = jnp.maximum(jnp.max(sim, axis=-1, keepdims=True), 0.0)
    e = jnp.exp(sim - m)
    denom = jnp.sum(e, axis=-1, keepdims=True) + jnp.exp(-m)
    soft = e / denom                                        # first NCLS softmax entries
    obj = jax.nn.sigmoid(logit_last) ** alpha               # (B*Q, 1), broadcasts
    fused_ref[...] = _inv_sigmoid(soft * obj).astype(fused_ref.dtype)


def decode_and_fuse(hs, refs, roi_features, text_feature, head_params,
                    tau=EVAL_TAU, alpha=OBJ_ALPHA):
    # hs: (L, B, Q, D); refs: (L, B, Q, 4) in sigmoid space (reference[:-1]);
    # roi_features: (B, Q, CLIP_D); text_feature: (NCLS, CLIP_D).
    l_, b_, q_, d_ = hs.shape
    rows = l_ * b_ * q_
    n_last = b_ * q_
    ncls = text_feature.shape[0]
    w1, b1, w2, b2, w3p, wcp, blast = head_params

    hs_flat = hs.reshape(rows, d_)
    ref5 = jnp.concatenate(
        [refs.reshape(rows, 4), jnp.full((rows, 1), 0.5, refs.dtype)], axis=-1)
    roi_flat = roi_features.reshape(n_last, roi_features.shape[-1])
    txt_t = text_feature.T                                  # (CLIP_D, NCLS)

    head, fused = pl.pallas_call(
        functools.partial(heads_fuse_kernel, n_last=n_last, tau=tau, alpha=alpha),
        out_shape=(jax.ShapeDtypeStruct((rows, 5), jnp.float32),
                   jax.ShapeDtypeStruct((n_last, ncls), jnp.float32)),
    )(hs_flat, ref5, roi_flat, txt_t, w1, b1, w2, b2, w3p, wcp, blast)

    coords = head[:, 0:4].reshape(l_, b_, q_, 4)
    logits = head[:, 4:5].reshape(l_, b_, q_, 1)
    pred_logits = fused.reshape(b_, q_, ncls)
    return coords, logits, pred_logits


# ---------------- parameter construction (deterministic) ----------------
def make_params(key):
    keys = jax.random.split(key, 8)
    # input_proj: per level Conv2d(CIN, D, 1) xavier_uniform + zero bias, GN affine
    bound = math.sqrt(6.0 / (CIN + D))
    w_lvl = jax.random.uniform(keys[0], (NUM_LEVELS, CIN, D), jnp.float32, -bound, bound)
    b_lvl = jnp.zeros((NUM_LEVELS, 1, D), jnp.float32)
    g_lvl = jnp.ones((NUM_LEVELS, 1, D), jnp.float32)
    be_lvl = jnp.zeros((NUM_LEVELS, 1, D), jnp.float32)
    proj_params = (w_lvl, b_lvl, g_lvl, be_lvl)
    # bbox MLP (D -> D -> D -> 4); last layer zero-initialized (as in the module)
    s = 1.0 / math.sqrt(D)
    w1 = jax.random.uniform(keys[1], (D, D), jnp.float32, -s, s)
    b1 = jax.random.uniform(keys[2], (1, D), jnp.float32, -s, s)
    w2 = jax.random.uniform(keys[3], (D, D), jnp.float32, -s, s)
    b2 = jax.random.uniform(keys[4], (1, D), jnp.float32, -s, s)
    w3 = jnp.zeros((D, 4), jnp.float32)
    b3 = jnp.zeros((1, 4), jnp.float32)
    # class embed: Linear(D, 1), bias = -log((1-p)/p), p=0.01
    wc = jax.random.uniform(keys[5], (D, 1), jnp.float32, -s, s)
    bc = jnp.full((1, 1), -math.log((1 - 0.01) / 0.01), jnp.float32)
    # merged last layer: output columns [bbox delta (4) | class logit (1)]
    w3p = jnp.concatenate([w3, jnp.zeros((D, 1), jnp.float32)], axis=1)   # (D, 5)
    wcp = jnp.concatenate([jnp.zeros((D, 4), jnp.float32), wc], axis=1)   # (D, 5)
    blast = jnp.concatenate([b3, bc], axis=1)                             # (1, 5)
    head_params = (w1, b1, w2, b2, w3p, wcp, blast)
    return proj_params, head_params


# ---------------- forward (inference path of OV_DQUO) ----------------
def ov_dquo_forward(clip_feats, hs, reference, roi_features, text_feature,
                    proj_params, head_params):
    # 1) input_proj + GroupNorm over all feature levels (Pallas kernel A, one call)
    x_levels = jnp.stack(clip_feats, axis=0)                # (NLVL, N, HW, CIN)
    w_lvl, b_lvl, g_lvl, be_lvl = proj_params
    src_all = input_proj_gn(x_levels, w_lvl, b_lvl, g_lvl, be_lvl)   # (NLVL, N, HW, D)
    srcs = [src_all[lvl] for lvl in range(src_all.shape[0])]
    # TODO(synk): backbone, transformer, classifier (text encoder), CDN prep and RoI
    # feature sampling are external submodules; hs / reference / roi_features /
    # text_feature are synthesized stand-ins for their outputs.
    # 2)+3) per-layer bbox+class heads fused with the eval-time CLIP fusion (kernel B)
    coords, logits, pred_logits = decode_and_fuse(
        hs, reference[:-1], roi_features, text_feature, head_params,
        tau=EVAL_TAU, alpha=OBJ_ALPHA)
    out = {
        "pred_boxes": coords[-1],          # sigmoid-space boxes, last decoder layer
        "pred_logits_raw": logits[-1],     # objectness logits before CLIP fusion
        "pred_logits": pred_logits,        # eval-time fused class logits
        "srcs": srcs,
        "aux_coords": coords,
        "aux_logits": logits,
    }
    return out


if __name__ == "__main__":
    key = jax.random.PRNGKey(0)
    k_feat, k_hs, k_ref, k_roi, k_txt, k_par = jax.random.split(key, 6)

    # synthetic backbone feature levels, NHWC flattened: (N, H*W, CIN)
    clip_feats = [
        jax.random.normal(jax.random.fold_in(k_feat, lvl), (N, H * W, CIN), jnp.float32)
        for lvl in range(NUM_LEVELS)
    ]
    # synthetic transformer outputs
    hs = jax.random.normal(k_hs, (L, N, Q, D), jnp.float32)
    reference = jax.nn.sigmoid(
        jax.random.normal(k_ref, (L + 1, N, Q, 4), jnp.float32))
    # synthetic RoI-sampled CLIP features and text features (normalized)
    roi = jax.random.normal(k_roi, (N, Q, CLIP_D), jnp.float32)
    roi = roi / jnp.linalg.norm(roi, axis=-1, keepdims=True)
    txt = jax.random.normal(k_txt, (NCLS, CLIP_D), jnp.float32)
    txt = txt / jnp.linalg.norm(txt, axis=-1, keepdims=True)

    proj_params, head_params = make_params(k_par)

    out = ov_dquo_forward(clip_feats, hs, reference, roi, txt,
                          proj_params, head_params)
    jax.block_until_ready(out["pred_logits"])
    jax.block_until_ready(out["pred_boxes"])
    for s in out["srcs"]:
        jax.block_until_ready(s)

    assert out["pred_boxes"].shape == (N, Q, 4)
    assert out["pred_logits"].shape == (N, Q, NCLS)
    assert out["srcs"][0].shape == (N, H * W, D)
    assert bool(jnp.all(jnp.isfinite(out["pred_logits"])))
    assert bool(jnp.all(jnp.isfinite(out["pred_boxes"])))
    assert bool(jnp.all(jnp.isfinite(out["srcs"][0])))
    print("KERNEL_OK")
</pallas_src>

<mosaic_0001>
module attributes {stable_mosaic.version = 11 : i64} {
  func.func @input_proj_gn_kernel(%arg0: i32, %arg1: memref<1x128x16xf32, #tpu.memory_space<vmem>>, %arg2: memref<1x16x64xf32, #tpu.memory_space<vmem>>, %arg3: memref<1x1x64xf32, #tpu.memory_space<vmem>>, %arg4: memref<1x1x64xf32, #tpu.memory_space<vmem>>, %arg5: memref<1x1x64xf32, #tpu.memory_space<vmem>>, %arg6: memref<64x64xf32, #tpu.memory_space<vmem>>, %arg7: memref<1x128x64xf32, #tpu.memory_space<vmem>>) attributes {dimension_semantics = [#tpu.dimension_semantics<parallel>], iteration_bounds = array<i64: 2>, scalar_prefetch = 0 : i64, scratch_operands = 0 : i64, tpu.core_type = #tpu.core_type<tc>, window_params = [{transform_indices = @transform_0, window_bounds = array<i64: 1, 128, 16>}, {transform_indices = @transform_1, window_bounds = array<i64: 1, 16, 64>}, {transform_indices = @transform_2, window_bounds = array<i64: 1, 1, 64>}, {transform_indices = @transform_3, window_bounds = array<i64: 1, 1, 64>}, {transform_indices = @transform_4, window_bounds = array<i64: 1, 1, 64>}, {pipeline_mode = #tpu.pipeline_mode<synchronous>, transform_indices = @transform_5, window_bounds = array<i64: 64, 64>}, {transform_indices = @transform_6, window_bounds = array<i64: 1, 128, 64>}]} {
    %c0 = arith.constant 0 : index
    %c0_0 = arith.constant 0 : index
    %c0_1 = arith.constant 0 : index
    %0 = vector.load %arg1[%c0, %c0_0, %c0_1] : memref<1x128x16xf32, #tpu.memory_space<vmem>>, vector<1x128x16xf32>
    %1 = vector.shape_cast %0 : vector<1x128x16xf32> to vector<128x16xf32>
    %c0_2 = arith.constant 0 : index
    %c0_3 = arith.constant 0 : index
    %c0_4 = arith.constant 0 : index
    %2 = vector.load %arg2[%c0_2, %c0_3, %c0_4] : memref<1x16x64xf32, #tpu.memory_space<vmem>>, vector<1x16x64xf32>
    %3 = vector.shape_cast %2 : vector<1x16x64xf32> to vector<16x64xf32>
    %cst = arith.constant dense<0.000000e+00> : vector<128x64xf32>
    %4 = tpu.matmul %1, %3, %cst {dimension_numbers = #tpu.dot_dimension_numbers<[1], [0], [0], [1], [0, 0, 1, 1], [], []>} : vector<128x16xf32>, vector<16x64xf32>, vector<128x64xf32> -> vector<128x64xf32>
    %c0_5 = arith.constant 0 : index
    %c0_6 = arith.constant 0 : index
    %c0_7 = arith.constant 0 : index
    %5 = vector.load %arg3[%c0_5, %c0_6, %c0_7] : memref<1x1x64xf32, #tpu.memory_space<vmem>>, vector<1x1x64xf32>
    %6 = vector.shape_cast %5 : vector<1x1x64xf32> to vector<1x64xf32>
    %7 = vector.broadcast %6 : vector<1x64xf32> to vector<128x64xf32>
    %8 = arith.addf %4, %7 : vector<128x64xf32>
    %c0_8 = arith.constant 0 : index
    %c0_9 = arith.constant 0 : index
    %c0_10 = arith.constant 0 : index
    %9 = vector.load %arg4[%c0_8, %c0_9, %c0_10] : memref<1x1x64xf32, #tpu.memory_space<vmem>>, vector<1x1x64xf32>
    %10 = vector.shape_cast %9 : vector<1x1x64xf32> to vector<1x64xf32>
    %c0_11 = arith.constant 0 : index
    %c0_12 = arith.constant 0 : index
    %c0_13 = arith.constant 0 : index
    %11 = vector.load %arg5[%c0_11, %c0_12, %c0_13] : memref<1x1x64xf32, #tpu.memory_space<vmem>>, vector<1x1x64xf32>
    %12 = vector.shape_cast %11 : vector<1x1x64xf32> to vector<1x64xf32>
    %c0_14 = arith.constant 0 : index
    %c0_15 = arith.constant 0 : index
    %13 = vector.load %arg6[%c0_14, %c0_15] : memref<64x64xf32, #tpu.memory_space<vmem>>, vector<64x64xf32>
    %14 = vector.extract_strided_slice %8 {offsets = [0, 0], sizes = [64, 64], strides = [1, 1]} : vector<128x64xf32> to vector<64x64xf32>
    %cst_16 = arith.constant dense<0.000000e+00> : vector<64xf32>
    %15 = vector.multi_reduction <add>, %14, %cst_16 [0] : vector<64x64xf32> to vector<64xf32>
    %16 = vector.shape_cast %15 : vector<64xf32> to vector<1x64xf32>
    %17 = arith.mulf %14, %14 : vector<64x64xf32>
    %cst_17 = arith.constant dense<0.000000e+00> : vector<64xf32>
    %18 = vector.multi_reduction <add>, %17, %cst_17 [0] : vector<64x64xf32> to vector<64xf32>
    %19 = vector.shape_cast %18 : vector<64xf32> to vector<1x64xf32>
    %cst_18 = arith.constant dense<0.000000e+00> : vector<1x64xf32>
    %20 = tpu.matmul %16, %13, %cst_18 {dimension_numbers = #tpu.dot_dimension_numbers<[1], [0], [0], [1], [0, 0, 1, 1], [], []>} : vector<1x64xf32>, vector<64x64xf32>, vector<1x64xf32> -> vector<1x64xf32>
    %cst_19 = arith.constant dense<0.000000e+00> : vector<1x64xf32>
    %21 = tpu.matmul %19, %13, %cst_19 {dimension_numbers = #tpu.dot_dimension_numbers<[1], [0], [0], [1], [0, 0, 1, 1], [], []>} : vector<1x64xf32>, vector<64x64xf32>, vector<1x64xf32> -> vector<1x64xf32>
    %22 = arith.mulf %20, %20 : vector<1x64xf32>
    %23 = arith.subf %21, %22 : vector<1x64xf32>
    %cst_20 = arith.constant 0.000000e+00 : f32
    %24 = vector.broadcast %cst_20 : f32 to vector<1x64xf32>
    %25 = arith.maximumf %23, %24 : vector<1x64xf32>
    %26 = vector.broadcast %20 : vector<1x64xf32> to vector<64x64xf32>
    %27 = arith.subf %14, %26 : vector<64x64xf32>
    %cst_21 = arith.constant 9.99999974E-6 : f32
    %28 = vector.broadcast %cst_21 : f32 to vector<1x64xf32>
    %29 = arith.addf %25, %28 : vector<1x64xf32>
    %30 = math.rsqrt %29 : vector<1x64xf32>
    %31 = vector.broadcast %30 : vector<1x64xf32> to vector<64x64xf32>
    %32 = arith.mulf %27, %31 : vector<64x64xf32>
    %33 = vector.broadcast %10 : vector<1x64xf32> to vector<64x64xf32>
    %34 = arith.mulf %32, %33 : vector<64x64xf32>
    %35 = vector.broadcast %12 : vector<1x64xf32> to vector<64x64xf32>
    %36 = arith.addf %34, %35 : vector<64x64xf32>
    %c0_22 = arith.constant 0 : index
    %c0_23 = arith.constant 0 : index
    %c0_24 = arith.constant 0 : index
    %37 = vector.load %arg7[%c0_22, %c0_23, %c0_24] : memref<1x128x64xf32, #tpu.memory_space<vmem>>, vector<1x64x64xf32>
    %38 = vector.shape_cast %37 : vector<1x64x64xf32> to vector<64x64xf32>
    %39 = vector.shape_cast %36 : vector<64x64xf32> to vector<1x64x64xf32>
    tpu.vector_store %arg7[%c0_22, %c0_23, %c0_24], %39 {strides = array<i32>} : memref<1x128x64xf32, #tpu.memory_space<vmem>>, vector<1x64x64xf32>,
    %40 = vector.extract_strided_slice %8 {offsets = [64, 0], sizes = [64, 64], strides = [1, 1]} : vector<128x64xf32> to vector<64x64xf32>
    %cst_25 = arith.constant dense<0.000000e+00> : vector<64xf32>
    %41 = vector.multi_reduction <add>, %40, %cst_25 [0] : vector<64x64xf32> to vector<64xf32>
    %42 = vector.shape_cast %41 : vector<64xf32> to vector<1x64xf32>
    %43 = arith.mulf %40, %40 : vector<64x64xf32>
    %cst_26 = arith.constant dense<0.000000e+00> : vector<64xf32>
    %44 = vector.multi_reduction <add>, %43, %cst_26 [0] : vector<64x64xf32> to vector<64xf32>
    %45 = vector.shape_cast %44 : vector<64xf32> to vector<1x64xf32>
    %cst_27 = arith.constant dense<0.000000e+00> : vector<1x64xf32>
    %46 = tpu.matmul %42, %13, %cst_27 {dimension_numbers = #tpu.dot_dimension_numbers<[1], [0], [0], [1], [0, 0, 1, 1], [], []>} : vector<1x64xf32>, vector<64x64xf32>, vector<1x64xf32> -> vector<1x64xf32>
    %cst_28 = arith.constant dense<0.000000e+00> : vector<1x64xf32>
    %47 = tpu.matmul %45, %13, %cst_28 {dimension_numbers = #tpu.dot_dimension_numbers<[1], [0], [0], [1], [0, 0, 1, 1], [], []>} : vector<1x64xf32>, vector<64x64xf32>, vector<1x64xf32> -> vector<1x64xf32>
    %48 = arith.mulf %46, %46 : vector<1x64xf32>
    %49 = arith.subf %47, %48 : vector<1x64xf32>
    %cst_29 = arith.constant 0.000000e+00 : f32
    %50 = vector.broadcast %cst_29 : f32 to vector<1x64xf32>
    %51 = arith.maximumf %49, %50 : vector<1x64xf32>
    %52 = vector.broadcast %46 : vector<1x64xf32> to vector<64x64xf32>
    %53 = arith.subf %40, %52 : vector<64x64xf32>
    %cst_30 = arith.constant 9.99999974E-6 : f32
    %54 = vector.broadcast %cst_30 : f32 to vector<1x64xf32>
    %55 = arith.addf %51, %54 : vector<1x64xf32>
    %56 = math.rsqrt %55 : vector<1x64xf32>
    %57 = vector.broadcast %56 : vector<1x64xf32> to vector<64x64xf32>
    %58 = arith.mulf %53, %57 : vector<64x64xf32>
    %59 = vector.broadcast %10 : vector<1x64xf32> to vector<64x64xf32>
    %60 = arith.mulf %58, %59 : vector<64x64xf32>
    %61 = vector.broadcast %12 : vector<1x64xf32> to vector<64x64xf32>
    %62 = arith.addf %60, %61 : vector<64x64xf32>
    %c0_31 = arith.constant 0 : index
    %c64 = arith.constant 64 : index
    %c0_32 = arith.constant 0 : index
    %63 = vector.load %arg7[%c0_31, %c64, %c0_32] : memref<1x128x64xf32, #tpu.memory_space<vmem>>, vector<1x64x64xf32>
    %64 = vector.shape_cast %63 : vector<1x64x64xf32> to vector<64x64xf32>
    %65 = vector.shape_cast %62 : vector<64x64xf32> to vector<1x64x64xf32>
    tpu.vector_store %arg7[%c0_31, %c64, %c0_32], %65 {strides = array<i32>} : memref<1x128x64xf32, #tpu.memory_space<vmem>>, vector<1x64x64xf32>,
    return
  }
  func.func @transform_0(%arg0: i32) -> (i32, i32, i32) {
    %c0_i32 = arith.constant 0 : i32
    %c0_i32_0 = arith.constant 0 : i32
    %c0_i32_1 = arith.constant 0 : i32
    return %arg0, %c0_i32, %c0_i32_0 : i32, i32, i32
  }
  func.func @transform_1(%arg0: i32) -> (i32, i32, i32) {
    %c0_i32 = arith.constant 0 : i32
    %c0_i32_0 = arith.constant 0 : i32
    %c0_i32_1 = arith.constant 0 : i32
    return %arg0, %c0_i32, %c0_i32_0 : i32, i32, i32
  }
  func.func @transform_2(%arg0: i32) -> (i32, i32, i32) {
    %c0_i32 = arith.constant 0 : i32
    %c0_i32_0 = arith.constant 0 : i32
    %c0_i32_1 = arith.constant 0 : i32
    return %arg0, %c0_i32, %c0_i32_0 : i32, i32, i32
  }
  func.func @transform_3(%arg0: i32) -> (i32, i32, i32) {
    %c0_i32 = arith.constant 0 : i32
    %c0_i32_0 = arith.constant 0 : i32
    %c0_i32_1 = arith.constant 0 : i32
    return %arg0, %c0_i32, %c0_i32_0 : i32, i32, i32
  }
  func.func @transform_4(%arg0: i32) -> (i32, i32, i32) {
    %c0_i32 = arith.constant 0 : i32
    %c0_i32_0 = arith.constant 0 : i32
    %c0_i32_1 = arith.constant 0 : i32
    return %arg0, %c0_i32, %c0_i32_0 : i32, i32, i32
  }
  func.func @transform_5(%arg0: i32) -> (i32, i32) {
    %c0_i32 = arith.constant 0 : i32
    %c0_i32_0 = arith.constant 0 : i32
    %c0_i32_1 = arith.constant 0 : i32
    return %c0_i32, %c0_i32_0 : i32, i32
  }
  func.func @transform_6(%arg0: i32) -> (i32, i32, i32) {
    %c0_i32 = arith.constant 0 : i32
    %c0_i32_0 = arith.constant 0 : i32
    %c0_i32_1 = arith.constant 0 : i32
    return %arg0, %c0_i32, %c0_i32_0 : i32, i32, i32
  }
}

</mosaic_0001>

<bundles_post_ra>
// kernel: tpu_custom_call.1
= control target key start
LH: loop header
LB: loop body
LE: loop exit
PB: predicated region body
PF: predicated region fallthrough
CT: control target
= control target key end

     0   :  { %s1404_s21 = smov 0   ;;  %s1815_s0 = inlined_call_operand.vmem [shape: f32[2,128,16], index: 0, kind: input, shape index: {}]   ;;  %s1816_s1 = inlined_call_operand.vmem [shape: f32[2,16,64], index: 1, kind: input, shape index: {}]   ;;  %s1817_s2 = inlined_call_operand.vmem [shape: f32[2,1,64], index: 2, kind: input, shape index: {}]   ;;  %s1818_s3 = inlined_call_operand.vmem [shape: f32[2,1,64], index: 3, kind: input, shape index: {}]   ;;  %s1819_s4 = inlined_call_operand.vmem [shape: f32[2,1,64], index: 4, kind: input, shape index: {}]   ;;  %s1820_s5 = inlined_call_operand.vmem [shape: f32[64,64], index: 5, kind: input, shape index: {}]   ;;  %s1821_s6 = inlined_call_operand.vmem [shape: f32[2,128,64], index: 6, kind: output, shape index: {}]  }
   0x1 LB: > { %s1148_s22 = sadd.s32 4294967295, %s1365_s21   ;;  %p1152_p0 = scmp.ge.s32.totalorder %s1365_s21, 1  ;;  %s1365_s21 = sphi %s1404_s21, %s16_s21  }
   0x2   : > { %p246_p1 = scmp.lt.s32.totalorder %s1365_s21, 3 }
   0x4   : > { %p247_p2 = pnand %p1152_p0, %p246_p1 }
   0x5   : > { %p290_p3 = scmp.lt.s32.totalorder (!%p247_p2), %s1148_s22, 1 }
   0x6   : > { %250 = sbr.rel (%p247_p2) target bundleno = 508 (0x1fc), region = 44 }
   0xb   : > { %s1823_s22 = smov (!%p290_p3, %s1148_s22), 1  ;;  %vm339_vm0 = vcmask 130048   ;;  %v1367_v18 = vmov 0.0   ;;  %v1462_v19 = vld [vmem:[%s1820_s5 + $0x38] sm:$0xff]  ;;  %v1471_v20 = vld [vmem:[%s1820_s5 + $0x30] sm:$0xff]  ;;  %v1480_v21 = vld [vmem:[%s1820_s5 + $0x28] sm:$0xff] }
   0xc   : > { %s1184_s23 = sshll.u32 %s1823_s22, 7  ;;  %s1185_s24 = sshll.u32 %s1823_s22, 4  ;;  %1269 = vmatprep.subr.mxu1 %v1367_v18  ;;  %v1489_v22 = vld [vmem:[%s1820_s5 + $0x20] sm:$0xff]  ;;  %v1498_v23 = vld [vmem:[%s1820_s5 + $0x18] sm:$0xff]  ;;  %v1507_v24 = vld [vmem:[%s1820_s5 + $0x10] sm:$0xff]  ;;  %vm1368_vm1 = vmmov 0  }
   0xd   : > { %s1421_s27 = scalar_lea.vmem %s1815_s0, %s1184_s23  ;;  %s299_s30 = scalar_lea.vmem %s1816_s1, %s1185_s24  ;;  %1270 = vmatpush3.msra.mxu1 %v1462_v19  ;;  %v1516_v25 = vld [vmem:[%s1820_s5 + $0x8] sm:$0xff]  ;;  %v1525_v26 = vld [vmem:[%s1820_s5] sm:$0xff]  ;;  %1285 = vmatprep.mubr.msk.f32.mxu1 %vm1368_vm1, %v1367_v18  ;;  %vm543_vm2 = vcmask 523264  }
   0xe   : > { %v331_v0 = vld [vmem:[%s299_s30 + $0x8] sm:$0xff]  ;;  %v330_v1 = vld [vmem:[%s299_s30] sm:$0xff]  ;;  %v316_v4 = vld [vmem:[%s1421_s27 + $0x10] sm:$0xff]  ;;  %1271 = vmatprep.subr.mxu1 %v1367_v18  ;;  %s302_s28 = scalar_lea.vmem %s1817_s2, %s1823_s22  ;;  %s305_s7 = scalar_lea.vmem %s1818_s3, %s1823_s22 }
   0xf   : > { %v314_v2 = vld [vmem:[%s1421_s27] sm:$0xff]  ;;  %1241 = vmatprep.subr.mxu0 %v331_v0  ;;  %v315_v3 = vld [vmem:[%s1421_s27 + $0x8] sm:$0xff]  ;;  %v317_v5 = vld [vmem:[%s1421_s27 + $0x18] sm:$0xff]  ;;  %1272 = vmatpush3.msra.mxu1 %v1471_v20  ;;  %s308_s10 = scalar_lea.vmem %s1819_s4, %s1823_s22  ;;  %s1741_s13 = scalar_lea.vmem %s1821_s6, %s1184_s23 }
  0x10   : > { %1245 = vmatprep.mubr.msk.f32.mxu0 %vm339_vm0, %v314_v2  ;;  %1242 = vmatpush3.msra.mxu0 %v331_v0  ;;  %v318_v6 = vld [vmem:[%s1421_s27 + $0x20] sm:$0xff]  ;;  %v319_v7 = vld [vmem:[%s1421_s27 + $0x28] sm:$0xff]  ;;  %v320_v8 = vld [vmem:[%s1421_s27 + $0x30] sm:$0xff] }
  0x11   : > { %1243 = vmatprep.subr.mxu0 %v330_v1  ;;  %v321_v9 = vld [vmem:[%s1421_s27 + $0x38] sm:$0xff]  ;;  %v322_v10 = vld [vmem:[%s1421_s27 + $0x40] sm:$0xff]  ;;  %v323_v11 = vld [vmem:[%s1421_s27 + $0x48] sm:$0xff]  ;;  %1273 = vmatprep.subr.mxu1 %v1367_v18 }
  0x12   : > { %1244 = vmatpush3.msra.mxu0 %v330_v1  ;;  %v324_v12 = vld [vmem:[%s1421_s27 + $0x50] sm:$0xff]  ;;  %v325_v13 = vld [vmem:[%s1421_s27 + $0x58] sm:$0xff]  ;;  %v326_v14 = vld [vmem:[%s1421_s27 + $0x60] sm:$0xff]  ;;  %1274 = vmatpush3.msra.mxu1 %v1480_v21 }
  0x13   : > { %1246 = vmatmul.mubr.msk.f32.vlgmr.msra.gmra.mxu0 %vm339_vm0, %v315_v3  ;;  %v327_v15 = vld [vmem:[%s1421_s27 + $0x68] sm:$0xff]  ;;  %v328_v16 = vld [vmem:[%s1421_s27 + $0x70] sm:$0xff]  ;;  %v329_v17 = vld [vmem:[%s1421_s27 + $0x78] sm:$0xff]  ;;  %1307 = vmatprep.subr.mxu0 %v1367_v18 }
  0x14   : > { %1248 = vmatprep.mubr.msk.f32.mxu0 %vm339_vm0, %v316_v4  ;;  %1308 = vmatpush3.msra.mxu0 %v1462_v19  ;;  %v1539_v27 = vld [vmem:[%s302_s28] ss:$0 sm:$0xff] }
  0x15   : > { %1309 = vmatprep.subr.mxu0 %v1367_v18  ;;  %1275 = vmatprep.subr.mxu1 %v1367_v18 }
  0x16   : > { %1310 = vmatpush3.msra.mxu0 %v1471_v20  ;;  %1276 = vmatpush3.msra.mxu1 %v1489_v22 }
  0x17   : > { %1249 = vmatmul.mubr.msk.f32.gmra.mxu0 %vm339_vm0, %v317_v5  ;;  %1311 = vmatprep.subr.mxu0 %v1367_v18 }
  0x18   : > { %1251 = vmatprep.mubr.msk.f32.mxu0 %vm339_vm0, %v318_v6  ;;  %1312 = vmatpush3.msra.mxu0 %v1480_v21 }
  0x19   : > { %1313 = vmatprep.subr.mxu0 %v1367_v18  ;;  %1277 = vmatprep.subr.mxu1 %v1367_v18 }
  0x1a   : > { %1314 = vmatpush3.msra.mxu0 %v1489_v22  ;;  %1278 = vmatpush3.msra.mxu1 %v1498_v23 }
  0x1b   : > { %1252 = vmatmul.mubr.msk.f32.gmra.mxu0 %vm339_vm0, %v319_v7  ;;  %1315 = vmatprep.subr.mxu0 %v1367_v18 }
  0x1c   : > { %1254 = vmatprep.mubr.msk.f32.mxu0 %vm339_vm0, %v320_v8  ;;  %1316 = vmatpush3.msra.mxu0 %v1498_v23 }
  0x1d   : > { %1279 = vmatprep.subr.mxu1 %v1367_v18  ;;  %1317 = vmatprep.subr.mxu0 %v1367_v18 }
  0x1e   : > { %1280 = vmatpush3.msra.mxu1 %v1507_v24  ;;  %1318 = vmatpush3.msra.mxu0 %v1507_v24 }
  0x1f   : > { %1255 = vmatmul.mubr.msk.f32.gmra.mxu0 %vm339_vm0, %v321_v9  ;;  %1281 = vmatprep.subr.mxu1 %v1367_v18 }
  0x20   : > { %1257 = vmatprep.mubr.msk.f32.mxu0 %vm339_vm0, %v322_v10  ;;  %1319 = vmatprep.subr.mxu0 %v1367_v18 }
  0x21   : > { %1282 = vmatpush3.msra.mxu1 %v1516_v25  ;;  %1320 = vmatpush3.msra.mxu0 %v1516_v25 }
  0x22   : > { %1283 = vmatprep.subr.mxu1 %v1367_v18  ;;  %1321 = vmatprep.subr.mxu0 %v1367_v18 }
  0x23   : > { %1258 = vmatmul.mubr.msk.f32.gmra.mxu0 %vm339_vm0, %v323_v11  ;;  %1284 = vmatpush3.msra.mxu1 %v1525_v26 }
  0x24   : > { %1260 = vmatprep.mubr.msk.f32.mxu0 %vm339_vm0, %v324_v12  ;;  %1322 = vmatpush3.msra.mxu0 %v1525_v26 }
  0x25   : > { %1288 = vmatprep.subr.mxu1 %v1367_v18 }
  0x27   : > { %1261 = vmatmul.mubr.msk.f32.gmra.mxu0 %vm339_vm0, %v325_v13 }
  0x28   : > { %1263 = vmatprep.mubr.msk.f32.mxu0 %vm339_vm0, %v326_v14 }
  0x2b   : > { %1264 = vmatmul.mubr.msk.f32.gmra.mxu0 %vm339_vm0, %v327_v15 }
  0x2c   : > { %1266 = vmatprep.mubr.msk.f32.mxu0 %vm339_vm0, %v328_v16 }
  0x2f   : > { %1267 = vmatmul.mubr.msk.f32.gmra.mxu0 %vm339_vm0, %v329_v17 }
  0x30   : > { %1323 = vmatprep.mubr.msk.f32.mxu0 %vm1368_vm1, %v1367_v18 }
  0xd3   : > { %v1247_v28 = vpop.f32.mrf.mxu0 }
  0xd4   : > { %v1542_v29 = vadd.f32 %v1247_v28, %v1539_v27 }
  0xd5   : > { %v454_v30 = vpop.f32.mrf.mxu0 }
  0xd6   : > { %v1545_v31 = vadd.f32 %v1539_v27, %v454_v30  ;;  %v566_v32 = vmul.f32 %v1542_v29, %v1542_v29  ;;  %v545_v38 = vsel %vm543_vm2, %v1542_v29, 0.0 }
  0xd7   : > { %v1250_v33 = vpop.f32.mrf.mxu0 }
  0xd8   : > { %v544_v34 = vsel %vm543_vm2, %v1545_v31, 0.0  ;;  %v565_v35 = vmul.f32 %v1545_v31, %v1545_v31  ;;  %v1554_v36 = vadd.f32 %v1250_v33, %v1539_v27  ;;  %v574_v41 = vsel %vm543_vm2, %v566_v32, 0.0 }
  0xd9   : > { %v464_v37 = vpop.f32.mrf.mxu0  ;;  %v546_v42 = vadd.f32 %v545_v38, %v544_v34 }
  0xda   : > { %v573_v39 = vsel %vm543_vm2, %v565_v35, 0.0  ;;  %v1560_v40 = vadd.f32 %v1539_v27, %v464_v37  ;;  %v568_v44 = vmul.f32 %v1554_v36, %v1554_v36  ;;  %v549_v51 = vsel %vm543_vm2, %v1554_v36, 0.0 }
  0xdb   : > { %v1253_v43 = vpop.f32.mrf.mxu0  ;;  %v575_v48 = vadd.f32 %v574_v41, %v573_v39 }
  0xdc   : > { %v547_v45 = vsel %vm543_vm2, %v1560_v40, 0.0  ;;  %v567_v46 = vmul.f32 %v1560_v40, %v1560_v40  ;;  %v1570_v47 = vadd.f32 %v1253_v43, %v1539_v27  ;;  %v578_v57 = vsel %vm543_vm2, %v568_v44, 0.0 }
  0xdd   : > { %v548_v49 = vadd.f32 %v547_v45, %v546_v42  ;;  %v474_v50 = vpop.f32.mrf.mxu0 }
  0xde   : > { %v576_v52 = vsel %vm543_vm2, %v567_v46, 0.0  ;;  %v1576_v53 = vadd.f32 %v1539_v27, %v474_v50  ;;  %v570_v58 = vmul.f32 %v1570_v47, %v1570_v47  ;;  %v553_v1 = vsel %vm543_vm2, %v1570_v47, 0.0 }
  0xdf   : > { %v577_v54 = vadd.f32 %v576_v52, %v575_v48  ;;  %v550_v55 = vadd.f32 %v549_v51, %v548_v49  ;;  %v1256_v56 = vpop.f32.mrf.mxu0 }
  0xe0   : > { %v551_v59 = vsel %vm543_vm2, %v1576_v53, 0.0  ;;  %v569_v60 = vmul.f32 %v1576_v53, %v1576_v53  ;;  %v1586_v63 = vadd.f32 %v1256_v56, %v1539_v27  ;;  %v582_v7 = vsel %vm543_vm2, %v570_v58, 0.0 }
  0xe1   : > { %v552_v61 = vadd.f32 %v551_v59, %v550_v55  ;;  %v579_v62 = vadd.f32 %v578_v57, %v577_v54  ;;  %v484_v0 = vpop.f32.mrf.mxu0 }
  0xe2   : > { %v580_v2 = vsel %vm543_vm2, %v569_v60, 0.0  ;;  %v1592_v3 = vadd.f32 %v1539_v27, %v484_v0  ;;  %v557_v11 = vsel %vm543_vm2, %v1586_v63, 0.0  ;;  %v572_v12 = vmul.f32 %v1586_v63, %v1586_v63 }
  0xe3   : > { %v581_v4 = vadd.f32 %v580_v2, %v579_v62  ;;  %v554_v5 = vadd.f32 %v553_v1, %v552_v61  ;;  %v1259_v6 = vpop.f32.mrf.mxu0 }
  0xe4   : > { %v555_v8 = vsel %vm543_vm2, %v1592_v3, 0.0  ;;  %v571_v9 = vmul.f32 %v1592_v3, %v1592_v3  ;;  %v1600_v10 = vadd.f32 %v1259_v6, %v1539_v27  ;;  %v586_v44 = vsel %vm543_vm2, %v572_v12, 0.0 }
  0xe5   : > { %v556_v13 = vadd.f32 %v555_v8, %v554_v5  ;;  %v583_v14 = vadd.f32 %v582_v7, %v581_v4  ;;  %v494_v15 = vpop.f32.mrf.mxu0 }
  0xe6   : > { %v584_v16 = vsel %vm543_vm2, %v571_v9, 0.0  ;;  %v806_v17 = vsel %vm543_vm2, %v1600_v10, 0.0  ;;  %v827_v28 = vmul.f32 %v1600_v10, %v1600_v10  ;;  %v1612_v30 = vadd.f32 %v1539_v27, %v494_v15 }
  0xe7   : > { %v558_v32 = vadd.f32 %v557_v11, %v556_v13  ;;  %v585_v33 = vadd.f32 %v584_v16, %v583_v14  ;;  %v1262_v34 = vpop.f32.mrf.mxu0 }
  0xe8   : > { %v835_v35 = vsel %vm543_vm2, %v827_v28, 0.0  ;;  %v805_v37 = vsel %vm543_vm2, %v1612_v30, 0.0  ;;  %v826_v38 = vmul.f32 %v1612_v30, %v1612_v30  ;;  %v1620_v39 = vadd.f32 %v1262_v34, %v1539_v27 }
  0xe9   : > { %v559_v41 = vrot.slane %v558_v32, 4  ;;  %v807_v42 = vadd.f32 %v806_v17, %v805_v37  ;;  %v504_v43 = vpop.f32.mrf.mxu0  ;;  %v587_v50 = vadd.f32 %v586_v44, %v585_v33 }
  0xea   : > { %v834_v45 = vsel %vm543_vm2, %v826_v38, 0.0  ;;  %v829_v46 = vmul.f32 %v1620_v39, %v1620_v39  ;;  %v1627_v48 = vadd.f32 %v1539_v27, %v504_v43  ;;  %v810_v54 = vsel %vm543_vm2, %v1620_v39, 0.0 }
  0xeb   : > { %v560_v49 = vadd.f32 %v559_v41, %v558_v32  ;;  %v836_v51 = vadd.f32 %v835_v35, %v834_v45  ;;  %v1265_v52 = vpop.f32.mrf.mxu0  ;;  %v588_v2 = vrot.slane %v587_v50, 4 }
  0xec   : > { %v808_v55 = vsel %vm543_vm2, %v1627_v48, 0.0  ;;  %v828_v56 = vmul.f32 %v1627_v48, %v1627_v48  ;;  %v1636_v57 = vadd.f32 %v1265_v52, %v1539_v27  ;;  %v839_v61 = vsel %vm543_vm2, %v829_v46, 0.0 }
  0xed   : > { %v809_v58 = vadd.f32 %v808_v55, %v807_v42  ;;  %v514_v59 = vpop.f32.mrf.mxu0  ;;  %v561_v60 = vrot.slane %v560_v49, 2  ;;  %v589_v33 = vadd.f32 %v588_v2, %v587_v50 }
  0xee   : > { %v837_v62 = vsel %vm543_vm2, %v828_v56, 0.0  ;;  %v831_v0 = vmul.f32 %v1636_v57, %v1636_v57  ;;  %v1643_v1 = vadd.f32 %v1539_v27, %v514_v59  ;;  %v814_v8 = vsel %vm543_vm2, %v1636_v57, 0.0 }
  0xef   : > { %v838_v4 = vadd.f32 %v837_v62, %v836_v51  ;;  %v811_v5 = vadd.f32 %v810_v54, %v809_v58  ;;  %v1268_v6 = vpop.f32.mrf.mxu0  ;;  %v562_v7 = vadd.f32 %v561_v60, %v560_v49  ;;  %v590_v46 = vrot.slane %v589_v33, 2 }
  0xf0   : > { %v812_v9 = vsel %vm543_vm2, %v1643_v1, 0.0  ;;  %v830_v11 = vmul.f32 %v1643_v1, %v1643_v1  ;;  %v1652_v12 = vadd.f32 %v1268_v6, %v1539_v27  ;;  %v843_v17 = vsel %vm543_vm2, %v831_v0, 0.0 }
  0xf1   : > { %v813_v13 = vadd.f32 %v812_v9, %v811_v5  ;;  %v840_v14 = vadd.f32 %v839_v61, %v838_v4  ;;  %v524_v15 = vpop.f32.mrf.mxu0  ;;  %v563_v16 = vrot.slane %v562_v7, 1  ;;  %v591_v56 = vadd.f32 %v590_v46, %v589_v33 }
  0xf2   : > { %v841_v28 = vsel %vm543_vm2, %v830_v11, 0.0  ;;  %v1657_v32 = vadd.f32 %v1539_v27, %v524_v15  ;;  %v818_v38 = vsel %vm543_vm2, %v1652_v12, 0.0  ;;  %v833_v41 = vmul.f32 %v1652_v12, %v1652_v12 }
  0xf3   : > { %v842_v34 = vadd.f32 %v841_v28, %v840_v14  ;;  %v815_v35 = vadd.f32 %v814_v8, %v813_v13  ;;  %v564_v37 = vadd.f32 %v563_v16, %v562_v7  ;;  %v592_v61 = vrot.slane %v591_v56, 1 }
  0xf4   : > { %v816_v42 = vsel %vm543_vm2, %v1657_v32, 0.0  ;;  %v832_v43 = vmul.f32 %v1657_v32, %v1657_v32  ;;  %v847_v51 = vsel %vm543_vm2, %v833_v41, 0.0 }
  0xf5   : > { %v817_v44 = vadd.f32 %v816_v42, %v815_v35  ;;  %v844_v45 = vadd.f32 %v843_v17, %v842_v34  ;;  %1286 = vmatmul.mubr.msk.f32.vlgmr.msra.gmra.mxu1 %vm543_vm2, %v564_v37  ;;  %v593_v4 = vadd.f32 %v592_v61, %v591_v56 }
  0xf6   : > { %v845_v27 = vsel %vm543_vm2, %v832_v43, 0.0  ;;  %1289 = vmatpush3.msra.mxu1 %v1462_v19  ;;  %1304 = vmatprep.mubr.msk.f32.mxu1 %vm1368_vm1, %v1367_v18 }
  0xf7   : > { %v819_v49 = vadd.f32 %v818_v38, %v817_v44  ;;  %v846_v50 = vadd.f32 %v845_v27, %v844_v45  ;;  %1290 = vmatprep.subr.mxu1 %v1367_v18  ;;  %v1725_v45 = vld [vmem:[%s305_s7] ss:$0 sm:$0xff] }
  0xf8   : > { %1291 = vmatpush3.msra.mxu1 %v1471_v20 }
  0xf9   : > { %v820_v52 = vrot.slane %v819_v49, 4  ;;  %1292 = vmatprep.subr.mxu1 %v1367_v18  ;;  %v848_v55 = vadd.f32 %v847_v51, %v846_v50 }
  0xfa   : > { %1293 = vmatpush3.msra.mxu1 %v1480_v21 }
  0xfb   : > { %v821_v54 = vadd.f32 %v820_v52, %v819_v49  ;;  %1294 = vmatprep.subr.mxu1 %v1367_v18  ;;  %v849_v60 = vrot.slane %v848_v55, 4 }
  0xfc   : > { %1295 = vmatpush3.msra.mxu1 %v1489_v22 }
  0xfd   : > { %v822_v58 = vrot.slane %v821_v54, 2  ;;  %1296 = vmatprep.subr.mxu1 %v1367_v18  ;;  %v850_v2 = vadd.f32 %v849_v60, %v848_v55 }
  0xfe   : > { %1297 = vmatpush3.msra.mxu1 %v1498_v23 }
  0xff   : > { %v823_v59 = vadd.f32 %v822_v58, %v821_v54  ;;  %1298 = vmatprep.subr.mxu1 %v1367_v18  ;;  %v851_v5 = vrot.slane %v850_v2, 2 }
 0x100   : > { %1299 = vmatpush3.msra.mxu1 %v1507_v24 }
 0x101   : > { %v824_v62 = vrot.slane %v823_v59, 1  ;;  %1300 = vmatprep.subr.mxu1 %v1367_v18  ;;  %v852_v6 = vadd.f32 %v851_v5, %v850_v2 }
 0x102   : > { %1301 = vmatpush3.msra.mxu1 %v1516_v25 }
 0x103   : > { %v825_v0 = vadd.f32 %v824_v62, %v823_v59  ;;  %1302 = vmatprep.subr.mxu1 %v1367_v18 }
 0x104   : > { %1303 = vmatpush3.msra.mxu1 %v1525_v26 }
 0x105   : > { %1305 = vmatmul.mubr.msk.f32.vlgmr.msra.gmra.mxu1 %vm543_vm2, %v593_v4  ;;  %1326 = vmatprep.subr.mxu1 %v1367_v18 }
 0x106   : > { %1324 = vmatmul.mubr.msk.f32.vlgmr.msra.gmra.mxu0 %vm543_vm2, %v825_v0  ;;  %1327 = vmatpush3.msra.mxu1 %v1462_v19  ;;  %v853_v19 = vrot.slane %v852_v6, 1 }
 0x107   : > { %1328 = vmatprep.subr.mxu1 %v1367_v18  ;;  %1342 = vmatprep.mubr.msk.f32.mxu1 %vm1368_vm1, %v1367_v18 }
 0x108   : > { %1329 = vmatpush3.msra.mxu1 %v1471_v20  ;;  %v854_v20 = vadd.f32 %v853_v19, %v852_v6 }
 0x109   : > { %1330 = vmatprep.subr.mxu1 %v1367_v18 }
 0x10a   : > { %1331 = vmatpush3.msra.mxu1 %v1480_v21 }
 0x10b   : > { %1332 = vmatprep.subr.mxu1 %v1367_v18 }
 0x10c   : > { %1333 = vmatpush3.msra.mxu1 %v1489_v22 }
 0x10d   : > { %1334 = vmatprep.subr.mxu1 %v1367_v18 }
 0x10e   : > { %1335 = vmatpush3.msra.mxu1 %v1498_v23 }
 0x10f   : > { %1336 = vmatprep.subr.mxu1 %v1367_v18 }
 0x110   : > { %1337 = vmatpush3.msra.mxu1 %v1507_v24 }
 0x111   : > { %1338 = vmatprep.subr.mxu1 %v1367_v18 }
 0x112   : > { %1339 = vmatpush3.msra.mxu1 %v1516_v25  ;;  %v743_v25 = vlaneseq }
 0x113   : > { %1340 = vmatprep.subr.mxu1 %v1367_v18 }
 0x114   : > { %1341 = vmatpush3.msra.mxu1 %v1525_v26  ;;  %v744_v18 = vshrl.u32 %v743_v25, 7 }
 0x115   : > { %1343 = vmatmul.mubr.msk.f32.vlgmr.msra.gmra.mxu1 %vm543_vm2, %v854_v20 }
 0x116   : > { %v745_v15 = vsub.s32 0, %v744_v18 }
 0x1b5   : > { %v663_v21 = vpop.f32.mrf.mxu1 }
 0x1b6   : > { %v740_v7 = vmul.f32 %v663_v21, %v663_v21  ;;  %v746_v16 = vrot.slane %v663_v21, %v745_v15 }
 0x1b7   : > { %v1287_v22 = vpop.f32.mrf.mxu1 }
 0x1b8   : > { %v747_v37 = vsub.f32 %v1545_v31, %v746_v16  ;;  %v748_v38 = vsub.f32 %v1542_v29, %v746_v16  ;;  %v749_v41 = vsub.f32 %v1560_v40, %v746_v16  ;;  %v750_v42 = vsub.f32 %v1554_v36, %v746_v16  ;;  %v1730_v40 = vld [vmem:[%s308_s10] ss:$0 sm:$0xff] }
 0x1b9   : > { %v751_v43 = vsub.f32 %v1576_v53, %v746_v16  ;;  %v752_v27 = vsub.f32 %v1570_v47, %v746_v16  ;;  %v753_v46 = vsub.f32 %v1592_v3, %v746_v16  ;;  %v754_v29 = vsub.f32 %v1586_v63, %v746_v16 }
 0x1c5   : > { %v736_v23 = vpop.f32.mrf.mxu1 }
 0x1c6   : > { %v741_v8 = vsub.f32 %v736_v23, %v740_v7  ;;  %v1708_v9 = vpop.f32.mrf.mxu0 }
 0x1c7   : > { %v1306_v24 = vpop.f32.mrf.mxu1  ;;  %v1001_v26 = vmul.f32 %v1708_v9, %v1708_v9  ;;  %v1007_v21 = vrot.slane %v1708_v9, %v745_v15 }
 0x1c8   : > { %v742_v11 = vmax.f32 %v741_v8, 0.0  ;;  %v1325_v13 = vpop.f32.mrf.mxu0 }
 0x1c9   : > { %v1008_v7 = vsub.f32 %v1612_v30, %v1007_v21  ;;  %v1009_v23 = vsub.f32 %v1600_v10, %v1007_v21  ;;  %v1010_v8 = vsub.f32 %v1627_v48, %v1007_v21  ;;  %v1011_v24 = vsub.f32 %v1620_v39, %v1007_v21 }
 0x1ca   : > { %v755_v14 = vadd.f32 1e-05, %v742_v11  ;;  %v1012_v13 = vsub.f32 %v1643_v1, %v1007_v21  ;;  %v1013_v25 = vsub.f32 %v1636_v57, %v1007_v21  ;;  %v1015_v18 = vsub.f32 %v1652_v12, %v1007_v21 }
 0x1cc   : > { %1355 = vrsqrt.f32 %v755_v14  ;;  %v1014_v14 = vsub.f32 %v1657_v32, %v1007_v21 }
 0x1d5   : > { %v997_v17 = vpop.f32.mrf.mxu1 }
 0x1d6   : > { %v1002_v28 = vsub.f32 %v997_v17, %v1001_v26 }
 0x1d7   : > { %v1344_v33 = vpop.f32.mrf.mxu1 }
 0x1d8   : > { %v1003_v34 = vmax.f32 %v1002_v28, 0.0 }
 0x1d9   : > { %v1356_v35 = vpop.eup %1355 }
 0x1da   : > { %v760_v44 = vrot.slane %v1356_v35, %v745_v15  ;;  %v1016_v31 = vadd.f32 1e-05, %v1003_v34 }
 0x1dc   : > { %v761_v49 = vmul.f32 %v760_v44, %v747_v37  ;;  %v762_v50 = vmul.f32 %v760_v44, %v748_v38  ;;  %v763_v51 = vmul.f32 %v760_v44, %v749_v41  ;;  %v764_v52 = vmul.f32 %v760_v44, %v750_v42 }
 0x1dd   : > { %v765_v36 = vmul.f32 %v760_v44, %v751_v43  ;;  %v766_v54 = vmul.f32 %v760_v44, %v752_v27  ;;  %v767_v53 = vmul.f32 %v760_v44, %v753_v46  ;;  %v768_v55 = vmul.f32 %v760_v44, %v754_v29 }
 0x1de   : > { %v775_v56 = vmul.f32 %v1725_v45, %v761_v49  ;;  %v776_v47 = vmul.f32 %v1725_v45, %v762_v50  ;;  %v777_v3 = vmul.f32 %v1725_v45, %v763_v51  ;;  %v778_v58 = vmul.f32 %v1725_v45, %v764_v52 }
 0x1df   : > { %v779_v63 = vmul.f32 %v1725_v45, %v765_v36  ;;  %v780_v59 = vmul.f32 %v1725_v45, %v766_v54  ;;  %v781_v60 = vmul.f32 %v1725_v45, %v767_v53  ;;  %v782_v61 = vmul.f32 %v1725_v45, %v768_v55 }
 0x1e0   : > { %v789_v62 = vadd.f32 %v1730_v40, %v775_v56  ;;  %v790_v0 = vadd.f32 %v1730_v40, %v776_v47  ;;  %v791_v2 = vadd.f32 %v1730_v40, %v777_v3  ;;  %v792_v4 = vadd.f32 %v1730_v40, %v778_v58 }
 0x1e1   : > { %v793_v5 = vadd.f32 %v1730_v40, %v779_v63  ;;  %v794_v6 = vadd.f32 %v1730_v40, %v780_v59  ;;  %v795_v19 = vadd.f32 %v1730_v40, %v781_v60  ;;  %v796_v20 = vadd.f32 %v1730_v40, %v782_v61 }
 0x1e2   : > { %797 = vst.msk [vmem:[%s1741_s13] sm:$0xff] %vm543_vm2, %v789_v62  ;;  %798 = vst.msk [vmem:[%s1741_s13 + $0x8] sm:$0xff] %vm543_vm2, %v790_v0  ;;  %1357 = vrsqrt.f32 %v1016_v31 }
 0x1e3   : > { %799 = vst.msk [vmem:[%s1741_s13 + $0x10] sm:$0xff] %vm543_vm2, %v791_v2  ;;  %800 = vst.msk [vmem:[%s1741_s13 + $0x18] sm:$0xff] %vm543_vm2, %v792_v4 }
 0x1e4   : > { %801 = vst.msk [vmem:[%s1741_s13 + $0x20] sm:$0xff] %vm543_vm2, %v793_v5  ;;  %802 = vst.msk [vmem:[%s1741_s13 + $0x28] sm:$0xff] %vm543_vm2, %v794_v6 }
 0x1e5   : > { %803 = vst.msk [vmem:[%s1741_s13 + $0x30] sm:$0xff] %vm543_vm2, %v795_v19  ;;  %804 = vst.msk [vmem:[%s1741_s13 + $0x38] sm:$0xff] %vm543_vm2, %v796_v20 }
 0x1ef   : > { %v1358_v22 = vpop.eup %1357 }
 0x1f0   : > { %v1021_v11 = vrot.slane %v1358_v22, %v745_v15 }
 0x1f2   : > { %v1022_v26 = vmul.f32 %v1021_v11, %v1008_v7  ;;  %v1023_v9 = vmul.f32 %v1021_v11, %v1009_v23  ;;  %v1024_v16 = vmul.f32 %v1021_v11, %v1010_v8  ;;  %v1025_v17 = vmul.f32 %v1021_v11, %v1011_v24 }
 0x1f3   : > { %v1026_v30 = vmul.f32 %v1021_v11, %v1012_v13  ;;  %v1027_v28 = vmul.f32 %v1021_v11, %v1013_v25  ;;  %v1028_v10 = vmul.f32 %v1021_v11, %v1014_v14  ;;  %v1029_v33 = vmul.f32 %v1021_v11, %v1015_v18 }
 0x1f4   : > { %v1030_v48 = vmul.f32 %v1725_v45, %v1022_v26  ;;  %v1031_v39 = vmul.f32 %v1725_v45, %v1023_v9  ;;  %v1032_v57 = vmul.f32 %v1725_v45, %v1024_v16  ;;  %v1033_v1 = vmul.f32 %v1725_v45, %v1025_v17 }
 0x1f5   : > { %v1034_v12 = vmul.f32 %v1725_v45, %v1026_v30  ;;  %v1035_v32 = vmul.f32 %v1725_v45, %v1027_v28  ;;  %v1036_v15 = vmul.f32 %v1725_v45, %v1028_v10  ;;  %v1037_v34 = vmul.f32 %v1725_v45, %v1029_v33 }
 0x1f6   : > { %v1038_v35 = vadd.f32 %v1730_v40, %v1030_v48  ;;  %v1039_v37 = vadd.f32 %v1730_v40, %v1031_v39  ;;  %v1040_v38 = vadd.f32 %v1730_v40, %v1032_v57  ;;  %v1041_v41 = vadd.f32 %v1730_v40, %v1033_v1 }
 0x1f7   : > { %v1042_v42 = vadd.f32 %v1730_v40, %v1034_v12  ;;  %v1043_v43 = vadd.f32 %v1730_v40, %v1035_v32  ;;  %v1044_v44 = vadd.f32 %v1730_v40, %v1036_v15  ;;  %v1045_v27 = vadd.f32 %v1730_v40, %v1037_v34 }
 0x1f8   : > { %1046 = vst.msk [vmem:[%s1741_s13 + $0x40] sm:$0xff] %vm543_vm2, %v1038_v35  ;;  %1047 = vst.msk [vmem:[%s1741_s13 + $0x48] sm:$0xff] %vm543_vm2, %v1039_v37 }
 0x1f9   : > { %1048 = vst.msk [vmem:[%s1741_s13 + $0x50] sm:$0xff] %vm543_vm2, %v1040_v38  ;;  %1049 = vst.msk [vmem:[%s1741_s13 + $0x58] sm:$0xff] %vm543_vm2, %v1041_v41 }
 0x1fa   : > { %1050 = vst.msk [vmem:[%s1741_s13 + $0x60] sm:$0xff] %vm543_vm2, %v1042_v42  ;;  %1051 = vst.msk [vmem:[%s1741_s13 + $0x68] sm:$0xff] %vm543_vm2, %v1043_v43 }
 0x1fb   : > { %1052 = vst.msk [vmem:[%s1741_s13 + $0x70] sm:$0xff] %vm543_vm2, %v1044_v44  ;;  %1053 = vst.msk [vmem:[%s1741_s13 + $0x78] sm:$0xff] %vm543_vm2, %v1045_v27 }
 0x1fc PF: > { %s16_s21 = sadd.s32 1, %s1365_s21  }
 0x1fd   : > { %p13_p4 = scmp.ge.s32.totalorder %s16_s21, 4  }
 0x1ff   :  { %15 = sbr.rel (!%p13_p4) target bundleno = 1 (0x1), region = 86 }

</bundles_post_ra>
